<compile_context>
chip_gen: v6e
topology: v6e:2x2x1
jax: 0.10.0
libtpu: 0.0.40
codegen_flags: <defaults>
</compile_context>

<pallas_src>
import functools

import jax
import jax.numpy as jnp
from jax.experimental import pallas as pl
from jax.experimental.pallas import tpu as pltpu


def _perceptron_kernel(w_ref, b_ref, xp_ref, o_ref):
    # w_ref : (2,)      f32, SMEM  (scalar reads on the scalar path)
    # b_ref : (1,)      f32, SMEM
    # xp_ref: (16, C)   f32, VMEM  rows 0..7 = feature 0, rows 8..15 = feature 1
    # o_ref : (8,  C)   f32, VMEM  row-major flat index == batch index
    x0 = xp_ref[0:8, :]
    x1 = xp_ref[8:16, :]
    z = x0 * w_ref[0] + x1 * w_ref[1] + b_ref[0]          # VPU only, no MXU
    # sigmoid via tanh -> single EUP transcendental, no VPU divide.
    o_ref[...] = (0.5 * jnp.tanh(0.5 * z) + 0.5).astype(o_ref.dtype)


def perceptron_forward(x, w, b, *, lanes_per_step=65536, gridless_max_cols=32768):
    """x: (B, 2) f32, w: (1, 2) f32 (nn.Linear layout), b: (1,) f32 -> (B, 1)."""
    B, F = x.shape
    if F != 2:
        raise ValueError("Perceptron expects 2 input features")
    assert lanes_per_step % 128 == 0 and gridless_max_cols > 0

    w_vec = w.reshape(F).astype(x.dtype)   # (2,) -> SMEM
    b_vec = b.reshape(1).astype(x.dtype)   # (1,) -> SMEM

    # Pad batch to a multiple of 8 only when needed (<= 7 rows; no-op otherwise).
    pad = (-B) % 8
    xpad = jnp.pad(x, ((0, pad), (0, 0))) if pad else x
    Bp = B + pad
    C = Bp // 8

    # (Bp, 2) -> (2, Bp) transpose (one extra HBM pass, see header note), then a
    # FREE contiguous reshape to the sublane-packed (16, C) view.
    xp = xpad.T.reshape(16, C)

    out_shape = jax.ShapeDtypeStruct((8, C), x.dtype)
    smem = pl.BlockSpec(memory_space=pltpu.MemorySpace.SMEM)
    vmem_limit = 40 * 1024 * 1024  # > v5e's 16 MiB default, < v7x's 64 MiB/TC

    if C <= gridless_max_cols:
        # Single invocation: whole packed arrays resident in VMEM (<= ~3 MiB),
        # zero per-step pipeline overhead.
        out = pl.pallas_call(
            _perceptron_kernel,
            out_shape=out_shape,
            in_specs=[smem, smem,
                      pl.BlockSpec(memory_space=pltpu.MemorySpace.VMEM)],
            out_specs=pl.BlockSpec(memory_space=pltpu.MemorySpace.VMEM),
            compiler_params=pltpu.CompilerParams(vmem_limit_bytes=vmem_limit),
        )(w_vec, b_vec, xp)
    else:
        # Large batch: lane/sublane-dense tiles of 8*lanes_per_step batch
        # elements per step; partial trailing block handled by the pipeline
        # (no padding to tile multiples). "parallel" lets the axis shard
        # across TensorCores (v7x megacore).
        tb = lanes_per_step
        out = pl.pallas_call(
            _perceptron_kernel,
            out_shape=out_shape,
            grid=(pl.cdiv(C, tb),),
            in_specs=[smem, smem,
                      pl.BlockSpec((16, tb), lambda i: (0, i))],
            out_specs=pl.BlockSpec((8, tb), lambda i: (0, i)),
            compiler_params=pltpu.CompilerParams(
                dimension_semantics=("parallel",),
                vmem_limit_bytes=vmem_limit),
        )(w_vec, b_vec, xp)

    out_flat = out.reshape(Bp, 1)          # free: flat order == batch order
    return out_flat if pad == 0 else out_flat[:B]


if __name__ == "__main__":
    key = jax.random.PRNGKey(0)
    k_x1, k_x2, k_x3, k_w, k_b = jax.random.split(key, 5)

    # nn.Linear(2, 1): weight (1, 2), bias (1,)
    F = 2
    bound = 1.0 / jnp.sqrt(jnp.float32(F))
    w = jax.random.uniform(k_w, (1, F), jnp.float32, -bound, bound)
    b = jax.random.uniform(k_b, (1,), jnp.float32, -bound, bound)

    def ref_fn(x):
        return jax.nn.sigmoid(x @ w.T + b)

    # 1) Tiny batch -> gridless path.
    x1 = jax.random.normal(k_x1, (8, F), jnp.float32)
    o1 = jax.block_until_ready(perceptron_forward(x1, w, b))
    assert o1.shape == (8, 1)
    assert jnp.allclose(o1, ref_fn(x1), atol=1e-5), "gridless path mismatch"

    # 2) Batch not a multiple of 8 -> exercises the tiny tail pad.
    x2 = jax.random.normal(k_x2, (13, F), jnp.float32)
    o2 = jax.block_until_ready(perceptron_forward(x2, w, b))
    assert o2.shape == (13, 1)
    assert jnp.allclose(o2, ref_fn(x2), atol=1e-5), "unaligned-batch mismatch"

    # 3) Tiled (grid) path, exercised at small shapes via overridden tile sizes.
    x3 = jax.random.normal(k_x3, (2048, F), jnp.float32)
    o3 = jax.block_until_ready(
        perceptron_forward(x3, w, b, lanes_per_step=128, gridless_max_cols=16))
    assert o3.shape == (2048, 1)
    assert jnp.allclose(o3, ref_fn(x3), atol=1e-5), "tiled path mismatch"

    print("KERNEL_OK")
</pallas_src>

<mosaic_0001>
module attributes {stable_mosaic.version = 11 : i64} {
  func.func @_perceptron_kernel(%arg0: memref<2xf32, #tpu.memory_space<smem>>, %arg1: memref<1xf32, #tpu.memory_space<smem>>, %arg2: memref<16x1xf32, #tpu.memory_space<vmem>>, %arg3: memref<8x1xf32, #tpu.memory_space<vmem>>) attributes {dimension_semantics = [], scalar_prefetch = 0 : i64, scratch_operands = 0 : i64, tpu.core_type = #tpu.core_type<tc>} {
    %c0 = arith.constant 0 : index
    %c0_0 = arith.constant 0 : index
    %0 = vector.load %arg2[%c0, %c0_0] : memref<16x1xf32, #tpu.memory_space<vmem>>, vector<8x1xf32>
    %c8 = arith.constant 8 : index
    %c0_1 = arith.constant 0 : index
    %1 = vector.load %arg2[%c8, %c0_1] : memref<16x1xf32, #tpu.memory_space<vmem>>, vector<8x1xf32>
    %c0_2 = arith.constant 0 : index
    %2 = memref.load %arg0[%c0_2] : memref<2xf32, #tpu.memory_space<smem>>
    %3 = vector.broadcast %2 : f32 to vector<8x1xf32>
    %4 = arith.mulf %0, %3 : vector<8x1xf32>
    %c1 = arith.constant 1 : index
    %5 = memref.load %arg0[%c1] : memref<2xf32, #tpu.memory_space<smem>>
    %6 = vector.broadcast %5 : f32 to vector<8x1xf32>
    %7 = arith.mulf %1, %6 : vector<8x1xf32>
    %8 = arith.addf %4, %7 : vector<8x1xf32>
    %c0_3 = arith.constant 0 : index
    %9 = memref.load %arg1[%c0_3] : memref<1xf32, #tpu.memory_space<smem>>
    %10 = vector.broadcast %9 : f32 to vector<8x1xf32>
    %11 = arith.addf %8, %10 : vector<8x1xf32>
    %cst = arith.constant 5.000000e-01 : f32
    %12 = vector.broadcast %cst : f32 to vector<8x1xf32>
    %13 = arith.mulf %12, %11 : vector<8x1xf32>
    %14 = math.tanh %13 : vector<8x1xf32>
    %cst_4 = arith.constant 5.000000e-01 : f32
    %15 = vector.broadcast %cst_4 : f32 to vector<8x1xf32>
    %16 = arith.mulf %15, %14 : vector<8x1xf32>
    %cst_5 = arith.constant 5.000000e-01 : f32
    %17 = vector.broadcast %cst_5 : f32 to vector<8x1xf32>
    %18 = arith.addf %16, %17 : vector<8x1xf32>
    %c0_6 = arith.constant 0 : index
    %c0_7 = arith.constant 0 : index
    %19 = vector.load %arg3[%c0_6, %c0_7] : memref<8x1xf32, #tpu.memory_space<vmem>>, vector<8x1xf32>
    tpu.vector_store %arg3[%c0_6, %c0_7], %18 {strides = array<i32>} : memref<8x1xf32, #tpu.memory_space<vmem>>, vector<8x1xf32>,
    return
  }
}

</mosaic_0001>

<bundles_post_ra>
// kernel: tpu_custom_call.1
= control target key start
LH: loop header
LB: loop body
LE: loop exit
PB: predicated region body
PF: predicated region fallthrough
CT: control target
= control target key end

     0   :  { %9 = vsyncpa [#allocation4], 0  ;;  %s105_s0 = inlined_call_operand.vmem [shape: f32[2], index: 0, kind: input, shape index: {}]   ;;  %s106_s1 = inlined_call_operand.<no memory space> [shape: f32[1], index: 1, kind: input, shape index: {}]   ;;  %s107_s2 = inlined_call_operand.vmem [shape: f32[16,1], index: 2, kind: input, shape index: {}]   ;;  %s108_s3 = inlined_call_operand.vmem [shape: f32[8,1], index: 3, kind: output, shape index: {}]  }
   0x1   :  { %s16_s14 = sshll.u32 %s105_s0, 4  ;;  %s17_s14 = int_to_ptr.vmem [resolvable:$true] %s16_s14 }
   0x2   :  { %s55_s15 = scalar_lea.vmem %s17_s14, 16  ;;  %p60_p1 = scmp.lt.s32.totalorder %s17_s14, %s17_s14 }
   0x3   :  { %p56_p0 = scmp.ne.s32.totalorder %s17_s14, %s55_s15  ;;  %p61_p2 = scmp.lt.s32.totalorder %s55_s15, %s55_s15 }
   0x5   :  { %p62_p3 = por %p61_p2, %p60_p1 }
   0x7   :  { %p63_p4 = pnand %p62_p3, %p56_p0 }
   0x9   :  { %66 = shalt.err (!%p63_p4)
}
   0xa   :  { %s69_s16 = smov [#allocation3]  }
   0xb   :  { %19 = dma.vmem_to_smem %s17_s14, 16, %s69_s16, [#allocation4]  }
   0xc   :  { %67 = dma.done.wait [#allocation4], 16  }
   0xd   :  { %68 = vsyncadd [#allocation4], 4294967280 }
   0xe   :  { %27 = sfence }
   0xf   :  { %s30_s17 = sld [smem:[#allocation3]]  ;;  %v28_v0 = vld [vmem:[%s107_s2] sm:$0xff]  ;;  %v29_v1 = vld [vmem:[%s107_s2 + $0x8] sm:$0xff]  ;;  %v38_v6 = vstv %s106_s1  ;;  %vm44_vm0 = vcmask 7168  }
  0x10   :  { %s51_s18 = sld [smem:[#allocation3 + $0x1]] }
  0x15   :  { %v31_v2 = vstv %s30_s17 }
  0x16   :  { %v32_v3 = vmul.f32 %v31_v2, %v28_v0  ;;  %v34_v4 = vstv %s51_s18 }
  0x17   :  { %v35_v5 = vmul.f32 %v34_v4, %v29_v1 }
  0x19   :  { %v36_v7 = vadd.f32 %v35_v5, %v32_v3 }
  0x1b   :  { %v39_v8 = vadd.f32 %v38_v6, %v36_v7 }
  0x1d   :  { %v40_v9 = vmul.f32 0.5, %v39_v8 }
  0x1f   :  { %53 = vtanh.f32 %v40_v9 }
  0x2c   :  { %v54_v10 = vpop.eup %53 }
  0x2d   :  { %v42_v11 = vmul.f32 0.5, %v54_v10 }
  0x2f   :  { %v43_v12 = vadd.f32 0.5, %v42_v11 }
  0x31   :  { %45 = vst.msk [vmem:[%s108_s3] sm:$0xff] %vm44_vm0, %v43_v12 }
  0x32   :  { %50 = vsyncpa [#allocation4], 1 }

</bundles_post_ra>
